<compile_context>
chip_gen: v5e
topology: v5e:2x2
jax: 0.10.0
libtpu: 0.0.40
codegen_flags: <defaults>
</compile_context>

<pallas_src>
import jax
import jax.numpy as jnp
from jax.experimental import pallas as pl
from jax.experimental.pallas import tpu as pltpu

INPUT_SIZE = 50
N_FACTORS = 5

# Tiling is over *packed* rows (2 logical rows per packed row).
_MIN_BLOCK_ROWS = 512      # <= this many packed rows -> single full-extent block
_MAX_BLOCK_ROWS = 8192     # 8192 packed rows = 16384 logical rows (~4 MiB lane-padded buf)
_TARGET_GRID_STEPS = 4     # keep >= ~4 grid steps so DMA overlaps compute and
                           # both v7x TensorCores get work


def _soi_packed_kernel(x_ref, w_ref, o_ref):
    # x_ref: (TB, 2F) packed tile; w_ref: (2F, 4K) = [V_blockdiag | V2_blockdiag];
    # o_ref: (TB, 2K).  All in VMEM.
    x = x_ref[...]
    w = w_ref[...]
    kk = w.shape[1] // 2
    v_bd = w[:, :kk]      # (2F, 2K) block-diagonal V
    v2_bd = w[:, kk:]     # (2F, 2K) block-diagonal V^2

    # (x @ V)^2  — MXU matmul (f32 accumulation), squared on the VPU.
    pow_of_sum = jnp.dot(x, v_bd, preferred_element_type=jnp.float32)
    pow_of_sum = pow_of_sum * pow_of_sum

    # (x^2) @ (V^2) — second MXU matmul; V^2 was hoisted to the wrapper.
    sum_of_pow = jnp.dot(x * x, v2_bd, preferred_element_type=jnp.float32)

    o_ref[...] = (0.5 * (pow_of_sum - sum_of_pow)).astype(o_ref.dtype)


def second_order_interaction_fast(x, v):
    """Pallas TPU implementation of SOIFast.forward.

    x: (batch, n_feats) float32
    v: (n_feats, n_factors) float32
    returns: (batch, n_factors) float32
    """
    B, F = x.shape
    Fv, K = v.shape
    assert F == Fv, "feature dims must match"
    dtype = x.dtype

    # ---- Row packing: 2 logical rows per physical row (pad one row if B odd).
    B_pad = B + (B % 2)
    if B_pad != B:
        x = jnp.concatenate([x, jnp.zeros((1, F), dtype)], axis=0)
    B2 = B_pad // 2
    x_packed = x.reshape(B2, 2 * F)            # free: contiguous row-major reshape

    # ---- Block-diagonal weights; V and V^2 merged into one (2F, 4K) operand.
    z = jnp.zeros((F, K), v.dtype)
    v_bd = jnp.concatenate(
        [jnp.concatenate([v, z], axis=1), jnp.concatenate([z, v], axis=1)], axis=0)
    v2 = v * v
    v2_bd = jnp.concatenate(
        [jnp.concatenate([v2, z], axis=1), jnp.concatenate([z, v2], axis=1)], axis=0)
    w = jnp.concatenate([v_bd, v2_bd], axis=1)  # (2F, 4K) = (100, 20)

    # ---- Batch tile over packed rows.
    if B2 <= _MIN_BLOCK_ROWS:
        block = B2                              # full-extent block: always legal
        grid = (1,)
    else:
        block = -(-B2 // _TARGET_GRID_STEPS)    # aim for ~4 grid steps
        block = max(_MIN_BLOCK_ROWS, min(_MAX_BLOCK_ROWS, block))
        block = ((block + 7) // 8) * 8          # multiple of 8 sublanes (f32)
        grid = (pl.cdiv(B2, block),)            # edge block masked by Pallas

    cost = pl.CostEstimate(
        flops=2 * 2 * B_pad * F * K,            # two (B,F)x(F,K) logical matmuls
        transcendentals=0,
        bytes_accessed=B2 * 2 * F * 4 + 2 * F * 4 * K * 4 + B2 * 2 * K * 4,
    )

    out_packed = pl.pallas_call(
        _soi_packed_kernel,
        out_shape=jax.ShapeDtypeStruct((B2, 2 * K), dtype),
        grid=grid,
        in_specs=[
            pl.BlockSpec((block, 2 * F), lambda i: (i, 0)),   # x tile (pipelined)
            pl.BlockSpec((2 * F, 4 * K), lambda i: (0, 0)),   # [V_bd | V2_bd], VMEM-resident
        ],
        out_specs=pl.BlockSpec((block, 2 * K), lambda i: (i, 0)),
        compiler_params=pltpu.CompilerParams(
            dimension_semantics=("parallel",),   # shards grid steps across TCs on v7x
            vmem_limit_bytes=48 * 1024 * 1024,   # fits v7x's 64 MiB physical VMEM
        ),
        cost_estimate=cost,
    )(x_packed, w)

    # Un-pack: (B2, 2K) -> (B_pad, K), then drop the padded row if any.
    out = out_packed.reshape(B_pad, K)
    return out[:B]


class ModelFastPallas:
    """Mirrors ModelFast: forward(x) = SOIFast(INPUT_SIZE, N_FACTORS)(x)."""

    def __init__(self, key):
        # Matches torch init: self.v.data.uniform_(-0.01, 0.01)
        self.v = jax.random.uniform(
            key, (INPUT_SIZE, N_FACTORS), dtype=jnp.float32,
            minval=-0.01, maxval=0.01,
        )

    def __call__(self, x):
        return second_order_interaction_fast(x, self.v)


def _reference(x, v):
    # Same math as fmpytorch's slow path.
    return 0.5 * ((x @ v) ** 2 - (x * x) @ (v * v))


if __name__ == "__main__":
    key = jax.random.PRNGKey(0)
    k_param, k_x_small, k_x_mid = jax.random.split(key, 3)

    model = ModelFastPallas(k_param)

    # Small-shape check consistent with the module (batch=2).
    batch = 2
    x_small = jax.random.normal(k_x_small, (batch, INPUT_SIZE), dtype=jnp.float32)
    out_small = jax.block_until_ready(model(x_small))
    ref_small = _reference(x_small, model.v)
    assert out_small.shape == (batch, N_FACTORS)
    assert jnp.allclose(out_small, ref_small, atol=1e-5, rtol=1e-5)

    # Mid-size odd batch: exercises the pad-one-row path, multi-step grid and
    # the masked edge block.
    mid_batch = 2051
    x_mid = jax.random.normal(k_x_mid, (mid_batch, INPUT_SIZE), dtype=jnp.float32)
    out_mid = jax.block_until_ready(model(x_mid))
    ref_mid = _reference(x_mid, model.v)
    assert out_mid.shape == (mid_batch, N_FACTORS)
    assert jnp.allclose(out_mid, ref_mid, atol=1e-5, rtol=1e-5)

    print("KERNEL_OK")
</pallas_src>

<mosaic_0001>
module attributes {stable_mosaic.version = 11 : i64} {
  func.func @_soi_packed_kernel(%arg0: i32, %arg1: memref<1x100xf32, #tpu.memory_space<vmem>>, %arg2: memref<100x20xf32, #tpu.memory_space<vmem>>, %arg3: memref<1x10xf32, #tpu.memory_space<vmem>>) attributes {dimension_semantics = [#tpu.dimension_semantics<parallel>], iteration_bounds = array<i64: 1>, scalar_prefetch = 0 : i64, scratch_operands = 0 : i64, tpu.core_type = #tpu.core_type<tc>, window_params = [{transform_indices = @transform_0, window_bounds = array<i64: 1, 100>}, {pipeline_mode = #tpu.pipeline_mode<synchronous>, transform_indices = @transform_1, window_bounds = array<i64: 100, 20>}, {transform_indices = @transform_2, window_bounds = array<i64: 1, 10>}]} {
    %c0 = arith.constant 0 : index
    %c0_0 = arith.constant 0 : index
    %0 = vector.load %arg1[%c0, %c0_0] : memref<1x100xf32, #tpu.memory_space<vmem>>, vector<1x100xf32>
    %c0_1 = arith.constant 0 : index
    %c0_2 = arith.constant 0 : index
    %1 = vector.load %arg2[%c0_1, %c0_2] : memref<100x20xf32, #tpu.memory_space<vmem>>, vector<100x20xf32>
    %2 = vector.extract_strided_slice %1 {offsets = [0, 0], sizes = [100, 10], strides = [1, 1]} : vector<100x20xf32> to vector<100x10xf32>
    %3 = vector.extract_strided_slice %1 {offsets = [0, 10], sizes = [100, 10], strides = [1, 1]} : vector<100x20xf32> to vector<100x10xf32>
    %cst = arith.constant dense<0.000000e+00> : vector<1x10xf32>
    %4 = tpu.matmul %0, %2, %cst {dimension_numbers = #tpu.dot_dimension_numbers<[1], [0], [0], [1], [0, 0, 1, 1], [], []>} : vector<1x100xf32>, vector<100x10xf32>, vector<1x10xf32> -> vector<1x10xf32>
    %5 = arith.mulf %4, %4 : vector<1x10xf32>
    %6 = arith.mulf %0, %0 : vector<1x100xf32>
    %cst_3 = arith.constant dense<0.000000e+00> : vector<1x10xf32>
    %7 = tpu.matmul %6, %3, %cst_3 {dimension_numbers = #tpu.dot_dimension_numbers<[1], [0], [0], [1], [0, 0, 1, 1], [], []>} : vector<1x100xf32>, vector<100x10xf32>, vector<1x10xf32> -> vector<1x10xf32>
    %8 = arith.subf %5, %7 : vector<1x10xf32>
    %cst_4 = arith.constant 5.000000e-01 : f32
    %9 = vector.broadcast %cst_4 : f32 to vector<1x10xf32>
    %10 = arith.mulf %9, %8 : vector<1x10xf32>
    %c0_5 = arith.constant 0 : index
    %c0_6 = arith.constant 0 : index
    %11 = vector.load %arg3[%c0_5, %c0_6] : memref<1x10xf32, #tpu.memory_space<vmem>>, vector<1x10xf32>
    tpu.vector_store %arg3[%c0_5, %c0_6], %10 {strides = array<i32>} : memref<1x10xf32, #tpu.memory_space<vmem>>, vector<1x10xf32>,
    return
  }
  func.func @transform_0(%arg0: i32) -> (i32, i32) {
    %c0_i32 = arith.constant 0 : i32
    %c0_i32_0 = arith.constant 0 : i32
    return %arg0, %c0_i32 : i32, i32
  }
  func.func @transform_1(%arg0: i32) -> (i32, i32) {
    %c0_i32 = arith.constant 0 : i32
    %c0_i32_0 = arith.constant 0 : i32
    %c0_i32_1 = arith.constant 0 : i32
    return %c0_i32, %c0_i32_0 : i32, i32
  }
  func.func @transform_2(%arg0: i32) -> (i32, i32) {
    %c0_i32 = arith.constant 0 : i32
    %c0_i32_0 = arith.constant 0 : i32
    return %arg0, %c0_i32 : i32, i32
  }
}

</mosaic_0001>

<bundles_post_ra>
// kernel: tpu_custom_call.1
= control target key start
LH: loop header
LB: loop body
LE: loop exit
PB: predicated region body
PF: predicated region fallthrough
CT: control target
= control target key end

     0   :  { %s213_s11 = smov 118   ;;  %s279_s0 = inlined_call_operand.vmem [shape: f32[1,100], index: 0, kind: input, shape index: {}]   ;;  %s280_s1 = inlined_call_operand.vmem [shape: f32[100,20], index: 1, kind: input, shape index: {}]   ;;  %s281_s2 = inlined_call_operand.hbm [shape: f32[1,10], index: 2, kind: output, shape index: {}]  }
   0x1   :  { %v25_v0 = vld [vmem:[%s280_s1 + $0x60] sm:$0xf]  ;;  %v22_v2 = vld [vmem:[%s280_s1 + $0x48] sm:$0xff]  ;;  %v23_v3 = vld [vmem:[%s280_s1 + $0x50] sm:$0xff] }
   0x2   :  { %92 = vrot.lane.b32.xlu0 %v25_v0, %s213_s11  ;;  %v21_v1 = vld [vmem:[%s280_s1 + $0x40] sm:$0xff]  ;;  %v24_v4 = vld [vmem:[%s280_s1 + $0x58] sm:$0xff]  ;;  %v18_v7 = vld [vmem:[%s280_s1 + $0x28] sm:$0xff] }
   0x3   :  { %v162_v5 = vpack.i.bf16 %v21_v1, %v22_v2  ;;  %v17_v6 = vld [vmem:[%s280_s1 + $0x20] sm:$0xff] }
   0x4   :  { %v172_v8 = vpack.i.bf16 %v17_v6, %v18_v7 }
   0x5   :  { %163 = vrot.lane.b32.xlu1 %v162_v5, %s213_s11 }
   0x6   :  { %7 = vsyncpa [#allocation3], 0  ;;  %v157_v9 = vpack.i.bf16 %v23_v3, %v24_v4  ;;  %v19_v10 = vld [vmem:[%s280_s1 + $0x30] sm:$0xff]  ;;  %v20_v11 = vld [vmem:[%s280_s1 + $0x38] sm:$0xff]  ;;  %173 = vrot.lane.b32.xlu2 %v172_v8, %s213_s11  ;;  %vm30_vm0 = vcmask 1043456   ;;  %vm26_vm1 = vcmask 818176  }
   0x7   :  { %v15_v12 = vld [vmem:[%s280_s1 + $0x10] sm:$0xff]  ;;  %v16_v13 = vld [vmem:[%s280_s1 + $0x18] sm:$0xff]  ;;  %v167_v14 = vpack.i.bf16 %v19_v10, %v20_v11  ;;  %v13_v15 = vld [vmem:[%s280_s1] sm:$0xff]  ;;  %151 = vmatpush.msk.msra.mxu0 %vm30_vm0, %v25_v0  ;;  %s142_s12 = sshll.u32 %s281_s2, 4  ;;  %vm133_vm2 = vcmask 73728   ;;  %s143_s12 = int_to_ptr.hbm [resolvable:$true] %s142_s12 }
   0x8   :  { %v14_v16 = vld [vmem:[%s280_s1 + $0x8] sm:$0xff]  ;;  %v177_v17 = vpack.i.bf16 %v15_v12, %v16_v13  ;;  %v12_v19 = vld [vmem:[%s279_s0] sm:$0x1]  ;;  %s214_s0 = smov [#allocation2]  }
   0x9   :  { %v182_v18 = vpack.i.bf16 %v13_v15, %v14_v16  ;;  %38 = vmatpush.msra.mxu0 %v24_v4  ;;  %v55_v38 = vmul.f32 %v12_v19, %v12_v19  ;;  %s140_s9 = sshll.u32 %s214_s0, 4  ;;  %s141_s9 = int_to_ptr.vmem [resolvable:$true] %s140_s9 }
   0xa   :  { %158 = vrot.lane.b32.xlu0 %v157_v9, %s213_s11 }
   0xb   :  { %39 = vmatpush.msra.mxu0 %v23_v3 }
   0xd   :  { %168 = vrot.lane.b32.xlu1 %v167_v14, %s213_s11  ;;  %40 = vmatpush.msra.mxu0 %v22_v2 }
   0xe   :  { %178 = vrot.lane.b32.xlu2 %v177_v17, %s213_s11 }
   0xf   :  { %41 = vmatpush.msra.mxu0 %v21_v1 }
  0x11   :  { %42 = vmatpush.msra.mxu0 %v20_v11 }
  0x12   :  { %183 = vrot.lane.b32.xlu0 %v182_v18, %s213_s11 }
  0x13   :  { %43 = vmatpush.msra.mxu0 %v19_v10 }
  0x15   :  { %44 = vmatpush.msra.mxu0 %v18_v7 }
  0x17   :  { %45 = vmatpush.msra.mxu0 %v17_v6 }
  0x19   :  { %46 = vmatpush.msra.mxu0 %v16_v13 }
  0x1b   :  { %47 = vmatpush.msra.mxu0 %v15_v12 }
  0x1d   :  { %48 = vmatpush.msra.mxu0 %v14_v16 }
  0x1f   :  { %49 = vmatpush.msra.mxu0 %v13_v15 }
  0x20   :  { %152 = vmatmul.msk.f32.vlgmr.msra.gmra.mxu0 %vm26_vm1, %v12_v19 }
  0x60   :  { %v174_v24 = vpop.permute.xlu2 %173 }
  0x61   :  { %v175_v32 = vunpack.i.l.bf16 %v174_v24  ;;  %v176_v34 = vunpack.i.h.bf16 %v174_v24 }
  0x68   :  { %v179_v31 = vpop.permute.xlu2 %178 }
  0x69   :  { %v180_v33 = vunpack.i.l.bf16 %v179_v31  ;;  %v181_v36 = vunpack.i.h.bf16 %v179_v31 }
  0x74   :  { %v93_v20 = vpop.permute.xlu0 %92 }
  0x75   :  { %153 = vmatpush.msk.msra.mxu1 %vm30_vm0, %v93_v20 }
  0x77   :  { %v164_v21 = vpop.permute.xlu1 %163 }
  0x78   :  { %v165_v27 = vunpack.i.l.bf16 %v164_v21  ;;  %v166_v29 = vunpack.i.h.bf16 %v164_v21 }
  0x7c   :  { %v159_v22 = vpop.permute.xlu0 %158 }
  0x7d   :  { %v160_v23 = vunpack.i.l.bf16 %v159_v22  ;;  %v161_v25 = vunpack.i.h.bf16 %v159_v22 }
  0x7f   :  { %115 = vmatpush.msra.mxu1 %v160_v23  ;;  %v169_v26 = vpop.permute.xlu1 %168 }
  0x80   :  { %v170_v28 = vunpack.i.l.bf16 %v169_v26  ;;  %v171_v30 = vunpack.i.h.bf16 %v169_v26 }
  0x81   :  { %116 = vmatpush.msra.mxu1 %v161_v25 }
  0x83   :  { %117 = vmatpush.msra.mxu1 %v165_v27 }
  0x84   :  { %v184_v35 = vpop.permute.xlu0 %183 }
  0x85   :  { %118 = vmatpush.msra.mxu1 %v166_v29  ;;  %v185_v37 = vunpack.i.l.bf16 %v184_v35  ;;  %v186_v39 = vunpack.i.h.bf16 %v184_v35 }
  0x87   :  { %119 = vmatpush.msra.mxu1 %v170_v28 }
  0x89   :  { %120 = vmatpush.msra.mxu1 %v171_v30 }
  0x8b   :  { %121 = vmatpush.msra.mxu1 %v175_v32 }
  0x8d   :  { %122 = vmatpush.msra.mxu1 %v176_v34 }
  0x8f   :  { %123 = vmatpush.msra.mxu1 %v180_v33 }
  0x91   :  { %124 = vmatpush.msra.mxu1 %v181_v36 }
  0x93   :  { %125 = vmatpush.msra.mxu1 %v185_v37 }
  0x95   :  { %126 = vmatpush.msra.mxu1 %v186_v39 }
  0x96   :  { %154 = vmatmul.msk.f32.vlgmr.msra.gmra.mxu1 %vm26_vm1, %v55_v38 }
  0x9d   :  { %v51_v40 = vpop.f32.mrf.mxu0 }
  0x9e   :  { %v54_v41 = vmul.f32 %v51_v40, %v51_v40 }
 0x113   :  { %v128_v42 = vpop.f32.mrf.mxu1 }
 0x114   :  { %v131_v43 = vsub.f32 %v54_v41, %v128_v42 }
 0x116   :  { %v132_v44 = vmul.f32 0.5, %v131_v43 }
 0x118   :  { %134 = vst.msk [vmem:[#allocation2] sm:$0x1] %vm133_vm2, %v132_v44 }
 0x119   :  { %145 = dma.vmem_to_hbm [thread:$0]  %s141_s9, 16, %s143_s12, [#allocation3]  }
 0x11a   :  { %211 = dma.done.wait [#allocation3], 16  }
 0x11b   :  { %212 = vsyncadd [#allocation3], 4294967280 }
 0x11c   :  { %150 = vsyncpa [#allocation3], 1 }

</bundles_post_ra>
